<compile_context>
chip_gen: v7x
topology: tpu7x:2x2x1
jax: 0.10.0
libtpu: 0.0.40
codegen_flags: <defaults>
</compile_context>

<pallas_src>
import jax
import jax.numpy as jnp
from jax.experimental import pallas as pl
from jax.experimental.pallas import tpu as pltpu

EPS = 1e-3


def conv_bn_relu_kernel(x_ref, w_ref, gamma_ref, beta_ref, o_ref):
    # x_ref:     [M, K]       bf16   (im2col rows, M = N*H*W, K = KW*Cin)
    # w_ref:     [K, CP]      bf16   (CP = Cout padded to a multiple of 128)
    # gamma/beta:[1, CP]      f32    (zero in the padded channels)
    # o_ref:     [M, CP]      bf16
    # ---- conv as a single MXU matmul, f32 accumulation ----
    conv = jnp.dot(x_ref[...], w_ref[...], preferred_element_type=jnp.float32)

    # ---- BatchNorm2d (training-mode batch stats), one-pass moments ----
    inv_n = 1.0 / conv.shape[0]
    s1 = jnp.sum(conv, axis=0, keepdims=True)            # [1, CP]
    s2 = jnp.sum(conv * conv, axis=0, keepdims=True)     # [1, CP]
    mean = s1 * inv_n
    var = jnp.maximum(s2 * inv_n - mean * mean, 0.0)      # biased variance
    scale = gamma_ref[...] * jax.lax.rsqrt(var + EPS)     # [1, CP]
    bias = beta_ref[...] - mean * scale                   # [1, CP]

    # ---- fused normalize + affine + ReLU, single lane-dense write ----
    o_ref[...] = jnp.maximum(conv * scale + bias, 0.0).astype(o_ref.dtype)


def conv_bn_relu(x_nchw, weight, gamma, beta):
    """x_nchw: [N, Cin, H, W]; weight: [Cout, Cin, 1, KW]; returns NCHW f32."""
    N, Cin, H, W = x_nchw.shape
    Cout, _, KH, KW = weight.shape
    assert KH == 1
    pad = (KW - 1) // 2
    CP = ((Cout + 127) // 128) * 128          # lane-aligned padded Cout (256)
    M = N * H * W

    # glue: cast to bf16 FIRST, then NCHW -> channels-last rows, zero-pad W
    xb = x_nchw.astype(jnp.bfloat16)
    xb = jnp.transpose(xb, (0, 2, 3, 1)).reshape(N * H, W, Cin)
    xb = jnp.pad(xb, ((0, 0), (pad, pad), (0, 0)))        # [NH, W+2p, Cin]
    # glue: im2col -> [NH, W, KW*Cin] (tap-major, then channel), flatten rows
    cols = jnp.concatenate([xb[:, kw:kw + W, :] for kw in range(KW)], axis=-1)
    cols = cols.reshape(M, KW * Cin)                      # [M, K] bf16

    # glue: weight [Cout, Cin, 1, KW] -> [KW*Cin, Cout] (matches im2col order),
    # zero-pad output channels to CP
    wk = jnp.transpose(weight.astype(jnp.bfloat16)[:, :, 0, :], (2, 1, 0))
    wk = wk.reshape(KW * Cin, Cout)
    wk = jnp.pad(wk, ((0, 0), (0, CP - Cout)))            # [K, CP] bf16
    g = jnp.pad(gamma.astype(jnp.float32), (0, CP - Cout)).reshape(1, CP)
    b = jnp.pad(beta.astype(jnp.float32), (0, CP - Cout)).reshape(1, CP)

    out = pl.pallas_call(
        conv_bn_relu_kernel,
        out_shape=jax.ShapeDtypeStruct((M, CP), jnp.bfloat16),
        in_specs=[pl.BlockSpec(memory_space=pltpu.MemorySpace.VMEM)] * 4,
        out_specs=pl.BlockSpec(memory_space=pltpu.MemorySpace.VMEM),
        cost_estimate=pl.CostEstimate(
            flops=2 * M * (KW * Cin) * CP,
            transcendentals=CP,
            bytes_accessed=cols.size * 2 + wk.size * 2 + (g.size + b.size) * 4
            + M * CP * 2,
        ),
    )(cols, wk, g, b)

    # glue: drop padded channels, back to f32 NCHW
    out = out[:, :Cout].astype(jnp.float32)
    return jnp.transpose(out.reshape(N, H, W, Cout), (0, 3, 1, 2))


def reference(x_nchw, weight, gamma, beta):
    """Pure-JAX f32 reference (lax conv + training-mode BN + relu)."""
    conv = jax.lax.conv_general_dilated(
        x_nchw, weight, window_strides=(1, 1), padding=((0, 0), (3, 3)),
        dimension_numbers=("NCHW", "OIHW", "NCHW"),
        preferred_element_type=jnp.float32,
    )
    mean = jnp.mean(conv, axis=(0, 2, 3), keepdims=True)
    var = jnp.mean((conv - mean) ** 2, axis=(0, 2, 3), keepdims=True)
    y = (conv - mean) * jax.lax.rsqrt(var + EPS)
    y = y * gamma.reshape(1, -1, 1, 1) + beta.reshape(1, -1, 1, 1)
    return jnp.maximum(y, 0.0)


if __name__ == "__main__":
    N, Cin, H, W = 1, 128, 12, 12
    Cout, KW = 192, 7

    key = jax.random.PRNGKey(0)
    kx, kw, kg, kb = jax.random.split(key, 4)

    x = jax.random.normal(kx, (N, Cin, H, W), dtype=jnp.float32)
    weight = jax.random.normal(kw, (Cout, Cin, 1, KW), dtype=jnp.float32) * 0.05
    gamma = 1.0 + 0.1 * jax.random.normal(kg, (Cout,), dtype=jnp.float32)
    beta = 0.1 * jax.random.normal(kb, (Cout,), dtype=jnp.float32)

    out = conv_bn_relu(x, weight, gamma, beta)
    out = jax.block_until_ready(out)

    ref = jax.block_until_ready(reference(x, weight, gamma, beta))
    assert out.shape == (N, Cout, H, W)
    # bf16 MXU inputs / bf16 output with f32 accumulation & BN math
    assert jnp.allclose(out, ref, atol=3e-2, rtol=3e-2), float(jnp.max(jnp.abs(out - ref)))

    print("KERNEL_OK")
</pallas_src>

<mosaic_0001>
module attributes {stable_mosaic.version = 11 : i64} {
  func.func @conv_bn_relu_kernel(%arg0: memref<144x896xbf16, #tpu.memory_space<vmem>>, %arg1: memref<896x256xbf16, #tpu.memory_space<vmem>>, %arg2: memref<1x256xf32, #tpu.memory_space<vmem>>, %arg3: memref<1x256xf32, #tpu.memory_space<vmem>>, %arg4: memref<144x256xbf16, #tpu.memory_space<vmem>>) attributes {dimension_semantics = [], scalar_prefetch = 0 : i64, scratch_operands = 0 : i64, tpu.core_type = #tpu.core_type<tc>} {
    %c0 = arith.constant 0 : index
    %c0_0 = arith.constant 0 : index
    %0 = vector.load %arg0[%c0, %c0_0] : memref<144x896xbf16, #tpu.memory_space<vmem>>, vector<144x896xbf16>
    %c0_1 = arith.constant 0 : index
    %c0_2 = arith.constant 0 : index
    %1 = vector.load %arg1[%c0_1, %c0_2] : memref<896x256xbf16, #tpu.memory_space<vmem>>, vector<896x256xbf16>
    %cst = arith.constant dense<0.000000e+00> : vector<144x256xf32>
    %2 = tpu.matmul %0, %1, %cst {dimension_numbers = #tpu.dot_dimension_numbers<[1], [0], [0], [1], [0, 0, 1, 1], [], []>} : vector<144x896xbf16>, vector<896x256xbf16>, vector<144x256xf32> -> vector<144x256xf32>
    %cst_3 = arith.constant dense<0.000000e+00> : vector<256xf32>
    %3 = vector.multi_reduction <add>, %2, %cst_3 [0] : vector<144x256xf32> to vector<256xf32>
    %4 = vector.shape_cast %3 : vector<256xf32> to vector<1x256xf32>
    %5 = arith.mulf %2, %2 : vector<144x256xf32>
    %cst_4 = arith.constant dense<0.000000e+00> : vector<256xf32>
    %6 = vector.multi_reduction <add>, %5, %cst_4 [0] : vector<144x256xf32> to vector<256xf32>
    %7 = vector.shape_cast %6 : vector<256xf32> to vector<1x256xf32>
    %cst_5 = arith.constant 0.0069444445 : f32
    %8 = vector.broadcast %cst_5 : f32 to vector<1x256xf32>
    %9 = arith.mulf %4, %8 : vector<1x256xf32>
    %cst_6 = arith.constant 0.0069444445 : f32
    %10 = vector.broadcast %cst_6 : f32 to vector<1x256xf32>
    %11 = arith.mulf %7, %10 : vector<1x256xf32>
    %12 = arith.mulf %9, %9 : vector<1x256xf32>
    %13 = arith.subf %11, %12 : vector<1x256xf32>
    %cst_7 = arith.constant 0.000000e+00 : f32
    %14 = vector.broadcast %cst_7 : f32 to vector<1x256xf32>
    %15 = arith.maximumf %13, %14 : vector<1x256xf32>
    %c0_8 = arith.constant 0 : index
    %c0_9 = arith.constant 0 : index
    %16 = vector.load %arg2[%c0_8, %c0_9] : memref<1x256xf32, #tpu.memory_space<vmem>>, vector<1x256xf32>
    %cst_10 = arith.constant 1.000000e-03 : f32
    %17 = vector.broadcast %cst_10 : f32 to vector<1x256xf32>
    %18 = arith.addf %15, %17 : vector<1x256xf32>
    %19 = math.rsqrt %18 : vector<1x256xf32>
    %20 = arith.mulf %16, %19 : vector<1x256xf32>
    %c0_11 = arith.constant 0 : index
    %c0_12 = arith.constant 0 : index
    %21 = vector.load %arg3[%c0_11, %c0_12] : memref<1x256xf32, #tpu.memory_space<vmem>>, vector<1x256xf32>
    %22 = arith.mulf %9, %20 : vector<1x256xf32>
    %23 = arith.subf %21, %22 : vector<1x256xf32>
    %24 = vector.broadcast %20 : vector<1x256xf32> to vector<144x256xf32>
    %25 = arith.mulf %2, %24 : vector<144x256xf32>
    %26 = vector.broadcast %23 : vector<1x256xf32> to vector<144x256xf32>
    %27 = arith.addf %25, %26 : vector<144x256xf32>
    %cst_13 = arith.constant 0.000000e+00 : f32
    %28 = vector.broadcast %cst_13 : f32 to vector<144x256xf32>
    %29 = arith.maximumf %27, %28 : vector<144x256xf32>
    %30 = arith.truncf %29 : vector<144x256xf32> to vector<144x256xbf16>
    %c0_14 = arith.constant 0 : index
    %c0_15 = arith.constant 0 : index
    %31 = vector.load %arg4[%c0_14, %c0_15] : memref<144x256xbf16, #tpu.memory_space<vmem>>, vector<144x256xbf16>
    tpu.vector_store %arg4[%c0_14, %c0_15], %30 {strides = array<i32>} : memref<144x256xbf16, #tpu.memory_space<vmem>>, vector<144x256xbf16>,
    return
  }
}

</mosaic_0001>

<bundles_post_ra>
// kernel: tpu_custom_call.1
= control target key start
LH: loop header
LB: loop body
LE: loop exit
PB: predicated region body
PF: predicated region fallthrough
CT: control target
= control target key end

     0   :  { %9 = vsyncpa [#allocation3], 0  ;;  %s3088_s0 = inlined_call_operand.hbm [shape: bf16[144,896], index: 0, kind: input, shape index: {}]   ;;  %s3089_s1 = inlined_call_operand.hbm [shape: bf16[896,256], index: 1, kind: input, shape index: {}]   ;;  %s3090_s2 = inlined_call_operand.vmem [shape: f32[1,256], index: 2, kind: input, shape index: {}]   ;;  %s3091_s3 = inlined_call_operand.vmem [shape: f32[1,256], index: 3, kind: input, shape index: {}]   ;;  %s3092_s4 = inlined_call_operand.hbm [shape: bf16[144,256], index: 4, kind: output, shape index: {}]  }
   0x1   :  { %10 = vsyncpa [#allocation6], 0 }
   0x2   :  { %11 = vsyncpa [#allocation4], 0  ;;  %s2727_s15 = smov [#allocation2]   ;;  %s2655_s19 = scalar_lea.hbm %s3088_s0, 8064 }
   0x3   :  { %s17_s16 = sshll.u32 %s2727_s15, 4  ;;  %p2656_p0 = scmp.ne.s32.totalorder %s3088_s0, %s2655_s19  ;;  %s18_s16 = int_to_ptr.vmem [resolvable:$true] %s17_s16 }
   0x4   :  { %p2659_p1 = scmp.lt.u32.totalorder %s2655_s19, %s3088_s0 }
   0x6   :  { %p2661_p2 = pnand %p2659_p1, %p2656_p0 }
   0x8   :  { %2664 = shalt.err (!%p2661_p2)
}
   0x9   :  { %s2665_s24 = scalar_lea.vmem %s18_s16, 8064  ;;  %p2670_p4 = scmp.lt.s32.totalorder %s18_s16, %s18_s16 }
   0xa   :  { %p2666_p3 = scmp.ne.s32.totalorder %s18_s16, %s2665_s24  ;;  %p2671_p5 = scmp.lt.s32.totalorder %s2665_s24, %s2665_s24 }
   0xc   :  { %p2672_p6 = por %p2671_p5, %p2670_p4 }
   0xe   :  { %p2673_p7 = pnand %p2672_p6, %p2666_p3 }
  0x10   :  { %2676 = shalt.err (!%p2673_p7)
}
  0x11   :  { %s2728_s25 = smov 448   ;;  %s2729_s26 = smov 28  }
  0x12   :  { %23 = dma.hbm_to_vmem [thread:$0]  %s3088_s0, 8064, %s18_s16, [#allocation3], %s2728_s25, %s2728_s25, %s2729_s26  }
  0x13   :  { %s2730_s29 = smov [#allocation5]   ;;  %s2677_s7 = scalar_lea.hbm %s3089_s1, 14336 }
  0x14   :  { %s29_s30 = sshll.u32 %s2730_s29, 4  ;;  %p2678_p8 = scmp.ne.s32.totalorder %s3089_s1, %s2677_s7  ;;  %s30_s30 = int_to_ptr.vmem [resolvable:$true] %s29_s30 }
  0x15   :  { %p2681_p9 = scmp.lt.u32.totalorder %s2677_s7, %s3089_s1 }
  0x17   :  { %p2683_p10 = pnand %p2681_p9, %p2678_p8 }
  0x19   :  { %2686 = shalt.err (!%p2683_p10)
}
  0x1a   :  { %s2687_s12 = scalar_lea.vmem %s30_s30, 14336  ;;  %p2692_p12 = scmp.lt.s32.totalorder %s30_s30, %s30_s30 }
  0x1b   :  { %p2688_p11 = scmp.ne.s32.totalorder %s30_s30, %s2687_s12  ;;  %p2693_p13 = scmp.lt.s32.totalorder %s2687_s12, %s2687_s12 }
  0x1d   :  { %p2694_p0 = por %p2693_p13, %p2692_p12 }
  0x1f   :  { %p2695_p1 = pnand %p2694_p0, %p2688_p11 }
  0x21   :  { %2698 = shalt.err (!%p2695_p1)
}
  0x22   :  { %s2731_s0 = smov 128   ;;  %s2732_s13 = smov 8  }
  0x23   :  { %35 = dma.hbm_to_vmem [thread:$0]  %s3089_s1, 14336, %s30_s30, [#allocation6], %s2731_s0, %s2731_s0, %s2732_s13  }
  0x24   :  { %2721 = dma.done.wait [#allocation3], 8064  }
  0x25   :  { %2722 = vsyncadd [#allocation3], 4294959232 }
  0x26   :  { %2723 = dma.done.wait [#allocation6], 14336  }
  0x27   :  { %2724 = vsyncadd [#allocation6], 4294952960  ;;  %v2393_v0 = vld [vmem:[#allocation5 + $0x4] ss:$8 sps:$4 sm:$0xff]   ;;  %v2397_v2 = vld [vmem:[#allocation5] ss:$8 sps:$4 sm:$0xff]  }
  0x28   :  { %v2395_v1 = vld [vmem:[#allocation5 + $0x204] ss:$8 sps:$4 sm:$0xff]   ;;  %1115 = vmatprep.subr.bf16.mxu1 %v2393_v0  ;;  %v2398_v3 = vld [vmem:[#allocation5 + $0x200] ss:$8 sps:$4 sm:$0xff]   ;;  %v2399_v4 = vld [vmem:[#allocation5 + $0x14] ss:$8 sps:$4 sm:$0xff]  }
  0x29   :  { %1361 = vmatprep.subr.bf16.mxu0 %v2395_v1  ;;  %1116 = vmatpush1.bf16.msra.mxu1 %v2397_v2  ;;  %v2401_v5 = vld [vmem:[#allocation5 + $0x214] ss:$8 sps:$4 sm:$0xff]   ;;  %v2403_v6 = vld [vmem:[#allocation5 + $0x10] ss:$8 sps:$4 sm:$0xff]   ;;  %v2405_v8 = vld [vmem:[#allocation5 + $0x24] ss:$8 sps:$4 sm:$0xff]  }
  0x2a   :  { %1362 = vmatpush1.bf16.msra.mxu0 %v2398_v3  ;;  %1117 = vmatprep.subr.bf16.mxu1 %v2399_v4  ;;  %v2404_v7 = vld [vmem:[#allocation5 + $0x210] ss:$8 sps:$4 sm:$0xff]   ;;  %v2407_v9 = vld [vmem:[#allocation5 + $0x224] ss:$8 sps:$4 sm:$0xff]   ;;  %v2409_v10 = vld [vmem:[#allocation5 + $0x20] ss:$8 sps:$4 sm:$0xff]  }
  0x2b   :  { %1363 = vmatprep.subr.bf16.mxu0 %v2401_v5  ;;  %v2410_v11 = vld [vmem:[#allocation5 + $0x220] ss:$8 sps:$4 sm:$0xff]   ;;  %v2411_v12 = vld [vmem:[#allocation5 + $0x34] ss:$8 sps:$4 sm:$0xff]   ;;  %v2415_v14 = vld [vmem:[#allocation5 + $0x30] ss:$8 sps:$4 sm:$0xff]  }
  0x2c   :  { %v2413_v13 = vld [vmem:[#allocation5 + $0x234] ss:$8 sps:$4 sm:$0xff]   ;;  %v2416_v15 = vld [vmem:[#allocation5 + $0x230] ss:$8 sps:$4 sm:$0xff]   ;;  %v2417_v16 = vld [vmem:[#allocation5 + $0x44] ss:$8 sps:$4 sm:$0xff]  }
  0x2d   :  { %1118 = vmatpush1.bf16.msra.mxu1 %v2403_v6  ;;  %v2419_v17 = vld [vmem:[#allocation5 + $0x244] ss:$8 sps:$4 sm:$0xff]   ;;  %v2421_v18 = vld [vmem:[#allocation5 + $0x40] ss:$8 sps:$4 sm:$0xff]   ;;  %v2423_v20 = vld [vmem:[#allocation5 + $0x54] ss:$8 sps:$4 sm:$0xff]  }
  0x2e   :  { %1364 = vmatpush1.bf16.msra.mxu0 %v2404_v7  ;;  %1119 = vmatprep.subr.bf16.mxu1 %v2405_v8  ;;  %v2422_v19 = vld [vmem:[#allocation5 + $0x240] ss:$8 sps:$4 sm:$0xff]   ;;  %v2425_v21 = vld [vmem:[#allocation5 + $0x254] ss:$8 sps:$4 sm:$0xff]   ;;  %v2427_v22 = vld [vmem:[#allocation5 + $0x50] ss:$8 sps:$4 sm:$0xff]  }
  0x2f   :  { %1365 = vmatprep.subr.bf16.mxu0 %v2407_v9  ;;  %v2428_v23 = vld [vmem:[#allocation5 + $0x250] ss:$8 sps:$4 sm:$0xff]   ;;  %v2429_v24 = vld [vmem:[#allocation5 + $0x64] ss:$8 sps:$4 sm:$0xff]   ;;  %v2433_v26 = vld [vmem:[#allocation5 + $0x60] ss:$8 sps:$4 sm:$0xff]  }
  0x30   :  { %v2431_v25 = vld [vmem:[#allocation5 + $0x264] ss:$8 sps:$4 sm:$0xff]   ;;  %v2434_v27 = vld [vmem:[#allocation5 + $0x260] ss:$8 sps:$4 sm:$0xff]   ;;  %v2435_v28 = vld [vmem:[#allocation5 + $0x74] ss:$8 sps:$4 sm:$0xff]  }
  0x31   :  { %1120 = vmatpush1.bf16.msra.mxu1 %v2409_v10  ;;  %v2437_v29 = vld [vmem:[#allocation5 + $0x274] ss:$8 sps:$4 sm:$0xff]   ;;  %v2439_v30 = vld [vmem:[#allocation5 + $0x70] ss:$8 sps:$4 sm:$0xff]   ;;  %v2441_v32 = vld [vmem:[#allocation5 + $0x84] ss:$8 sps:$4 sm:$0xff]  }
  0x32   :  { %1366 = vmatpush1.bf16.msra.mxu0 %v2410_v11  ;;  %1121 = vmatprep.subr.bf16.mxu1 %v2411_v12  ;;  %v2440_v31 = vld [vmem:[#allocation5 + $0x270] ss:$8 sps:$4 sm:$0xff]   ;;  %v2443_v33 = vld [vmem:[#allocation5 + $0x284] ss:$8 sps:$4 sm:$0xff]   ;;  %v2445_v34 = vld [vmem:[#allocation5 + $0x80] ss:$8 sps:$4 sm:$0xff]  }
  0x33   :  { %1367 = vmatprep.subr.bf16.mxu0 %v2413_v13  ;;  %v2446_v35 = vld [vmem:[#allocation5 + $0x280] ss:$8 sps:$4 sm:$0xff]   ;;  %v2447_v36 = vld [vmem:[#allocation5 + $0x94] ss:$8 sps:$4 sm:$0xff]   ;;  %v2451_v38 = vld [vmem:[#allocation5 + $0x90] ss:$8 sps:$4 sm:$0xff]  }
  0x34   :  { %v2449_v37 = vld [vmem:[#allocation5 + $0x294] ss:$8 sps:$4 sm:$0xff]   ;;  %v2452_v39 = vld [vmem:[#allocation5 + $0x290] ss:$8 sps:$4 sm:$0xff]   ;;  %v2453_v40 = vld [vmem:[#allocation5 + $0xa4] ss:$8 sps:$4 sm:$0xff]  }
  0x35   :  { %1122 = vmatpush1.bf16.msra.mxu1 %v2415_v14  ;;  %v2455_v41 = vld [vmem:[#allocation5 + $0x2a4] ss:$8 sps:$4 sm:$0xff]   ;;  %v2457_v42 = vld [vmem:[#allocation5 + $0xa0] ss:$8 sps:$4 sm:$0xff]   ;;  %v2459_v44 = vld [vmem:[#allocation5 + $0xb4] ss:$8 sps:$4 sm:$0xff]  }
  0x36   :  { %1368 = vmatpush1.bf16.msra.mxu0 %v2416_v15  ;;  %1123 = vmatprep.subr.bf16.mxu1 %v2417_v16  ;;  %v2458_v43 = vld [vmem:[#allocation5 + $0x2a0] ss:$8 sps:$4 sm:$0xff]   ;;  %v2461_v45 = vld [vmem:[#allocation5 + $0x2b4] ss:$8 sps:$4 sm:$0xff]   ;;  %v2463_v46 = vld [vmem:[#allocation5 + $0xb0] ss:$8 sps:$4 sm:$0xff]  }
  0x37   :  { %1369 = vmatprep.subr.bf16.mxu0 %v2419_v17  ;;  %v2464_v47 = vld [vmem:[#allocation5 + $0x2b0] ss:$8 sps:$4 sm:$0xff]   ;;  %v2465_v48 = vld [vmem:[#allocation5 + $0xc4] ss:$8 sps:$4 sm:$0xff]   ;;  %v2469_v52 = vld [vmem:[#allocation5 + $0xc0] ss:$8 sps:$4 sm:$0xff]  }
  0x38   :  { %v2491_v49 = vld [vmem:[#allocation2 + $0x4] ss:$28 sps:$4 sm:$0xff]   ;;  %v2494_v51 = vld [vmem:[#allocation2 + $0x14] ss:$28 sps:$4 sm:$0xff]   ;;  %v2504_v9 = vld [vmem:[#allocation2 + $0x3c] ss:$28 sps:$4 sm:$0xff]  }
  0x39   :  { %1124 = vmatpush1.bf16.msra.mxu1 %v2421_v18  ;;  %v2467_v50 = vld [vmem:[#allocation5 + $0x2c4] ss:$8 sps:$4 sm:$0xff]   ;;  %1147 = vmatprep.mubr.bf16.mxu1 %v2491_v49  ;;  %v2470_v53 = vld [vmem:[#allocation5 + $0x2c0] ss:$8 sps:$4 sm:$0xff]   ;;  %v2471_v54 = vld [vmem:[#allocation5 + $0xd4] ss:$8 sps:$4 sm:$0xff]  }
  0x3a   :  { %1370 = vmatpush1.bf16.msra.mxu0 %v2422_v19  ;;  %1125 = vmatprep.subr.bf16.mxu1 %v2423_v20  ;;  %v2473_v55 = vld [vmem:[#allocation5 + $0x2d4] ss:$8 sps:$4 sm:$0xff]   ;;  %v2475_v56 = vld [vmem:[#allocation5 + $0xd0] ss:$8 sps:$4 sm:$0xff]   ;;  %v2477_v58 = vld [vmem:[#allocation5 + $0xe4] ss:$8 sps:$4 sm:$0xff]  }
  0x3b   :  { %1371 = vmatprep.subr.bf16.mxu0 %v2425_v21  ;;  %1393 = vmatprep.mubr.bf16.mxu0 %v2494_v51  ;;  %v2476_v57 = vld [vmem:[#allocation5 + $0x2d0] ss:$8 sps:$4 sm:$0xff]   ;;  %v2479_v59 = vld [vmem:[#allocation5 + $0x2e4] ss:$8 sps:$4 sm:$0xff]   ;;  %v2481_v60 = vld [vmem:[#allocation5 + $0xe0] ss:$8 sps:$4 sm:$0xff]  }
  0x3c   :  { %v2482_v61 = vld [vmem:[#allocation5 + $0x2e0] ss:$8 sps:$4 sm:$0xff]   ;;  %v2483_v62 = vld [vmem:[#allocation5 + $0xf4] ss:$8 sps:$4 sm:$0xff]   ;;  %v2487_v0 = vld [vmem:[#allocation5 + $0xf0] ss:$8 sps:$4 sm:$0xff]  }
  0x3d   :  { %1126 = vmatpush1.bf16.msra.mxu1 %v2427_v22  ;;  %v2485_v63 = vld [vmem:[#allocation5 + $0x2f4] ss:$8 sps:$4 sm:$0xff]   ;;  %v2488_v1 = vld [vmem:[#allocation5 + $0x2f0] ss:$8 sps:$4 sm:$0xff]   ;;  %v2497_v2 = vld [vmem:[#allocation5 + $0x104] ss:$8 sps:$4 sm:$0xff]  }
  0x3e   :  { %1372 = vmatpush1.bf16.msra.mxu0 %v2428_v23  ;;  %1127 = vmatprep.subr.bf16.mxu1 %v2429_v24  ;;  %v2500_v3 = vld [vmem:[#allocation5 + $0x304] ss:$8 sps:$4 sm:$0xff]   ;;  %v2492_v5 = vld [vmem:[#allocation2 + $0x10] ss:$28 sps:$4 sm:$0xff]   ;;  %v2495_v6 = vld [vmem:[#allocation5 + $0x100] ss:$8 sps:$4 sm:$0xff]  }
  0x3f   :  { %1373 = vmatprep.subr.bf16.mxu0 %v2431_v25  ;;  %v2489_v4 = vld [vmem:[#allocation2] ss:$28 sps:$4 sm:$0xff]   ;;  %v2503_v8 = vld [vmem:[#allocation5 + $0x114] ss:$8 sps:$4 sm:$0xff]   ;;  %v2501_v12 = vld [vmem:[#allocation5 + $0x110] ss:$8 sps:$4 sm:$0xff]  }
  0x40   :  { %v2498_v7 = vld [vmem:[#allocation5 + $0x300] ss:$8 sps:$4 sm:$0xff]   ;;  %v2506_v10 = vld [vmem:[#allocation2 + $0x4c] ss:$28 sps:$4 sm:$0xff]   ;;  %v2512_v13 = vld [vmem:[#allocation5 + $0x124] ss:$8 sps:$4 sm:$0xff]  }
  0x41   :  { %1128 = vmatpush1.bf16.msra.mxu1 %v2433_v26  ;;  %v2515_v11 = vld [vmem:[#allocation5 + $0x314] ss:$8 sps:$4 sm:$0xff]   ;;  %v2513_v14 = vld [vmem:[#allocation5 + $0x310] ss:$8 sps:$4 sm:$0xff]   ;;  %v2530_v15 = vld [vmem:[#allocation5 + $0x324] ss:$8 sps:$4 sm:$0xff]  }
  0x42   :  { %1374 = vmatpush1.bf16.msra.mxu0 %v2434_v27  ;;  %1129 = vmatprep.subr.bf16.mxu1 %v2435_v28  ;;  %v2508_v16 = vld [vmem:[#allocation2 + $0x38] ss:$28 sps:$4 sm:$0xff]   ;;  %v2509_v17 = vld [vmem:[#allocation2 + $0x48] ss:$28 sps:$4 sm:$0xff]   ;;  %v2523_v25 = vld [vmem:[#allocation2 + $0x70] ss:$28 sps:$4 sm:$0xff]  }
  0x43   :  { %1375 = vmatprep.subr.bf16.mxu0 %v2437_v29  ;;  %v2510_v18 = vld [vmem:[#allocation5 + $0x120] ss:$8 sps:$4 sm:$0xff]   ;;  %v2518_v19 = vld [vmem:[#allocation5 + $0x134] ss:$8 sps:$4 sm:$0xff]   ;;  %v2516_v24 = vld [vmem:[#allocation5 + $0x130] ss:$8 sps:$4 sm:$0xff]  }
  0x44   :  { %v2519_v20 = vld [vmem:[#allocation2 + $0x74] ss:$28 sps:$4 sm:$0xff]   ;;  %v2521_v21 = vld [vmem:[#allocation2 + $0x84] ss:$28 sps:$4 sm:$0xff]  }
  0x45   :  { %1130 = vmatpush1.bf16.msra.mxu1 %v2439_v30  ;;  %v2528_v22 = vld [vmem:[#allocation5 + $0x320] ss:$8 sps:$4 sm:$0xff]   ;;  %v2545_v23 = vld [vmem:[#allocation5 + $0x334] ss:$8 sps:$4 sm:$0xff]   ;;  %v2527_v26 = vld [vmem:[#allocation5 + $0x144] ss:$8 sps:$4 sm:$0xff]  }
  0x46   :  { %1376 = vmatpush1.bf16.msra.mxu0 %v2440_v31  ;;  %1131 = vmatprep.subr.bf16.mxu1 %v2441_v32  ;;  %v2524_v27 = vld [vmem:[#allocation2 + $0x80] ss:$28 sps:$4 sm:$0xff]   ;;  %v2543_v28 = vld [vmem:[#allocation5 + $0x330] ss:$8 sps:$4 sm:$0xff]   ;;  %v2535_v31 = vld [vmem:[#allocation5 + $0x154] ss:$8 sps:$4 sm:$0xff]  }
  0x47   :  { %1377 = vmatprep.subr.bf16.mxu0 %v2443_v33  ;;  %v2525_v29 = vld [vmem:[#allocation5 + $0x140] ss:$8 sps:$4 sm:$0xff]   ;;  %v2531_v30 = vld [vmem:[#allocation2 + $0xac] ss:$28 sps:$4 sm:$0xff]   ;;  %v2560_v33 = vld [vmem:[#allocation5 + $0x344] ss:$8 sps:$4 sm:$0xff]  }
  0x48   :  { %v2536_v32 = vld [vmem:[#allocation2 + $0xbc] ss:$28 sps:$4 sm:$0xff]  }
  0x49   :  { %1132 = vmatpush1.bf16.msra.mxu1 %v2445_v34  ;;  %v2533_v34 = vld [vmem:[#allocation5 + $0x150] ss:$8 sps:$4 sm:$0xff]   ;;  %v2588_v49 = vld [vmem:[#allocation5 + $0x360] ss:$8 sps:$4 sm:$0xff]  }
  0x4a   :  { %1378 = vmatpush1.bf16.msra.mxu0 %v2446_v35  ;;  %1133 = vmatprep.subr.bf16.mxu1 %v2447_v36  ;;  %v2558_v35 = vld [vmem:[#allocation5 + $0x340] ss:$8 sps:$4 sm:$0xff]   ;;  %v2575_v36 = vld [vmem:[#allocation5 + $0x354] ss:$8 sps:$4 sm:$0xff]  }
  0x4b   :  { %1379 = vmatprep.subr.bf16.mxu0 %v2449_v37  ;;  %v2542_v37 = vld [vmem:[#allocation5 + $0x164] ss:$8 sps:$4 sm:$0xff]   ;;  %v2555_v51 = vld [vmem:[#allocation5 + $0x180] ss:$8 sps:$4 sm:$0xff]  }
  0x4d   :  { %1134 = vmatpush1.bf16.msra.mxu1 %v2451_v38  ;;  %v2538_v38 = vld [vmem:[#allocation2 + $0xa8] ss:$28 sps:$4 sm:$0xff]  }
  0x4e   :  { %1380 = vmatpush1.bf16.msra.mxu0 %v2452_v39  ;;  %1135 = vmatprep.subr.bf16.mxu1 %v2453_v40  ;;  %v2539_v39 = vld [vmem:[#allocation2 + $0xb8] ss:$28 sps:$4 sm:$0xff]  }
  0x4f   :  { %1381 = vmatprep.subr.bf16.mxu0 %v2455_v41  ;;  %v2540_v40 = vld [vmem:[#allocation5 + $0x160] ss:$8 sps:$4 sm:$0xff]  }
  0x50   :  { %v2546_v41 = vld [vmem:[#allocation2 + $0xe4] ss:$28 sps:$4 sm:$0xff]  }
  0x51   :  { %1136 = vmatpush1.bf16.msra.mxu1 %v2457_v42  ;;  %v2548_v42 = vld [vmem:[#allocation2 + $0xf4] ss:$28 sps:$4 sm:$0xff]  }
  0x52   :  { %1382 = vmatpush1.bf16.msra.mxu0 %v2458_v43  ;;  %1137 = vmatprep.subr.bf16.mxu1 %v2459_v44  ;;  %v2553_v43 = vld [vmem:[#allocation5 + $0x174] ss:$8 sps:$4 sm:$0xff]   ;;  %v2573_v44 = vld [vmem:[#allocation5 + $0x350] ss:$8 sps:$4 sm:$0xff]  }
  0x53   :  { %1383 = vmatprep.subr.bf16.mxu0 %v2461_v45  ;;  %v2590_v45 = vld [vmem:[#allocation5 + $0x364] ss:$8 sps:$4 sm:$0xff]  }
  0x55   :  { %1138 = vmatpush1.bf16.msra.mxu1 %v2463_v46  ;;  %v2551_v46 = vld [vmem:[#allocation5 + $0x170] ss:$8 sps:$4 sm:$0xff]  }
  0x56   :  { %1384 = vmatpush1.bf16.msra.mxu0 %v2464_v47  ;;  %1139 = vmatprep.subr.bf16.mxu1 %v2465_v48  ;;  %v2550_v47 = vld [vmem:[#allocation2 + $0xe0] ss:$28 sps:$4 sm:$0xff]  }
  0x57   :  { %1385 = vmatprep.subr.bf16.mxu0 %v2467_v50  ;;  %v2557_v48 = vld [vmem:[#allocation5 + $0x184] ss:$8 sps:$4 sm:$0xff]   ;;  %v2554_v50 = vld [vmem:[#allocation2 + $0xf0] ss:$28 sps:$4 sm:$0xff]  }
  0x59   :  { %1140 = vmatpush1.bf16.msra.mxu1 %v2469_v52  ;;  %v2561_v52 = vld [vmem:[#allocation2 + $0x11c] ss:$28 sps:$4 sm:$0xff]  }
  0x5a   :  { %1386 = vmatpush1.bf16.msra.mxu0 %v2470_v53  ;;  %1141 = vmatprep.subr.bf16.mxu1 %v2471_v54  ;;  %v2563_v53 = vld [vmem:[#allocation2 + $0x12c] ss:$28 sps:$4 sm:$0xff]  }
  0x5b   :  { %1387 = vmatprep.subr.bf16.mxu0 %v2473_v55  ;;  %v2569_v54 = vld [vmem:[#allocation5 + $0x194] ss:$8 sps:$4 sm:$0xff]  }
  0x5c   :  { %v2609_v55 = vld [vmem:[#allocation5 + $0x374] ss:$8 sps:$4 sm:$0xff]  }
  0x5d   :  { %1142 = vmatpush1.bf16.msra.mxu1 %v2475_v56  ;;  %v2607_v56 = vld [vmem:[#allocation5 + $0x370] ss:$8 sps:$4 sm:$0xff]  }
  0x5e   :  { %1388 = vmatpush1.bf16.msra.mxu0 %v2476_v57  ;;  %1143 = vmatprep.subr.bf16.mxu1 %v2477_v58  ;;  %v2567_v57 = vld [vmem:[#allocation5 + $0x190] ss:$8 sps:$4 sm:$0xff]   ;;  %v2565_v58 = vld [vmem:[#allocation2 + $0x118] ss:$28 sps:$4 sm:$0xff]  }
  0x5f   :  { %1389 = vmatprep.subr.bf16.mxu0 %v2479_v59  ;;  %v2572_v59 = vld [vmem:[#allocation5 + $0x1a4] ss:$8 sps:$4 sm:$0xff]  }
  0x61   :  { %1144 = vmatpush1.bf16.msra.mxu1 %v2481_v60  ;;  %v2566_v60 = vld [vmem:[#allocation2 + $0x128] ss:$28 sps:$4 sm:$0xff]  }
  0x62   :  { %1390 = vmatpush1.bf16.msra.mxu0 %v2482_v61  ;;  %1145 = vmatprep.subr.bf16.mxu1 %v2483_v62  ;;  %v2570_v61 = vld [vmem:[#allocation5 + $0x1a0] ss:$8 sps:$4 sm:$0xff]   ;;  %v2576_v62 = vld [vmem:[#allocation2 + $0x154] ss:$28 sps:$4 sm:$0xff]  }
  0x63   :  { %1391 = vmatprep.subr.bf16.mxu0 %v2485_v63  ;;  %v2578_v63 = vld [vmem:[#allocation2 + $0x164] ss:$28 sps:$4 sm:$0xff]  }
  0x65   :  { %1146 = vmatpush1.bf16.msra.mxu1 %v2487_v0  ;;  %v2584_v0 = vld [vmem:[#allocation5 + $0x1b4] ss:$8 sps:$4 sm:$0xff]  }
  0x66   :  { %1392 = vmatpush1.bf16.msra.mxu0 %v2488_v1  ;;  %1238 = vmatprep.subr.bf16.mxu1 %v2497_v2  ;;  %v2582_v1 = vld [vmem:[#allocation5 + $0x1b0] ss:$8 sps:$4 sm:$0xff]   ;;  %v2587_v2 = vld [vmem:[#allocation5 + $0x1c4] ss:$8 sps:$4 sm:$0xff]  }
  0x67   :  { %1484 = vmatprep.subr.bf16.mxu0 %v2500_v3  ;;  %v2580_v3 = vld [vmem:[#allocation2 + $0x150] ss:$28 sps:$4 sm:$0xff]  }
  0x68   :  { %1148 = vmatmul.mubr.bf16.vlgmr.msra.gmra.mrb[0].mxu1 %v2489_v4  ;;  %v2581_v4 = vld [vmem:[#allocation2 + $0x160] ss:$28 sps:$4 sm:$0xff]  }
  0x69   :  { %1394 = vmatmul.mubr.bf16.vlgmr.msra.gmra.mrb[0].mxu0 %v2492_v5  ;;  %1239 = vmatpush1.bf16.msra.mxu1 %v2495_v6  ;;  %v2585_v5 = vld [vmem:[#allocation5 + $0x1c0] ss:$8 sps:$4 sm:$0xff]   ;;  %v2591_v6 = vld [vmem:[#allocation2 + $0x18c] ss:$28 sps:$4 sm:$0xff]  }
  0x6a   :  { %1485 = vmatpush1.bf16.msra.mxu0 %v2498_v7  ;;  %1240 = vmatprep.subr.bf16.mxu1 %v2503_v8  ;;  %v2593_v7 = vld [vmem:[#allocation2 + $0x19c] ss:$28 sps:$4 sm:$0xff]   ;;  %v2599_v8 = vld [vmem:[#allocation5 + $0x1d4] ss:$8 sps:$4 sm:$0xff]  }
  0x6b   :  { %1157 = vmatprep.mubr.bf16.mxu1 %v2504_v9  ;;  %1403 = vmatprep.mubr.bf16.mxu0 %v2506_v10  ;;  %v2597_v9 = vld [vmem:[#allocation5 + $0x1d0] ss:$8 sps:$4 sm:$0xff]   ;;  %v2604_v10 = vld [vmem:[#allocation5 + $0x1e4] ss:$8 sps:$4 sm:$0xff]  }
  0x6c   :  { %1486 = vmatprep.subr.bf16.mxu0 %v2515_v11  ;;  %v2595_v11 = vld [vmem:[#allocation2 + $0x188] ss:$28 sps:$4 sm:$0xff]  }
  0x6d   :  { %1241 = vmatpush1.bf16.msra.mxu1 %v2501_v12  ;;  %v2596_v12 = vld [vmem:[#allocation2 + $0x198] ss:$28 sps:$4 sm:$0xff]  }
  0x6e   :  { %1487 = vmatpush1.bf16.msra.mxu0 %v2513_v14  ;;  %1242 = vmatprep.subr.bf16.mxu1 %v2512_v13  ;;  %v2600_v13 = vld [vmem:[#allocation2 + $0x1c4] ss:$28 sps:$4 sm:$0xff]   ;;  %v2605_v14 = vld [vmem:[#allocation2 + $0x1d4] ss:$28 sps:$4 sm:$0xff]  }
  0x6f   :  { %1488 = vmatprep.subr.bf16.mxu0 %v2530_v15  ;;  %v2602_v15 = vld [vmem:[#allocation5 + $0x1e0] ss:$8 sps:$4 sm:$0xff]  }
  0x70   :  { %1158 = vmatmul.mubr.bf16.gmra.mrb[4].mxu1 %v2508_v16  ;;  %v2614_v16 = vld [vmem:[#allocation5 + $0x1f4] ss:$8 sps:$4 sm:$0xff]  }
  0x71   :  { %1404 = vmatmul.mubr.bf16.gmra.mrb[4].mxu0 %v2509_v17  ;;  %1243 = vmatpush1.bf16.msra.mxu1 %v2510_v18  ;;  %v2612_v17 = vld [vmem:[#allocation5 + $0x1f0] ss:$8 sps:$4 sm:$0xff]   ;;  %v2610_v18 = vld [vmem:[#allocation2 + $0x1c0] ss:$28 sps:$4 sm:$0xff]  }
  0x72   :  { %1167 = vmatprep.mubr.bf16.mxu1 %v2519_v20  ;;  %1244 = vmatprep.subr.bf16.mxu1 %v2518_v19  ;;  %v2611_v19 = vld [vmem:[#allocation2 + $0x1d0] ss:$28 sps:$4 sm:$0xff]  }
  0x73   :  { %1413 = vmatprep.mubr.bf16.mxu0 %v2521_v21  ;;  %1489 = vmatpush1.bf16.msra.mxu0 %v2528_v22  ;;  %v2617_v20 = vld [vmem:[#allocation2 + $0xc] ss:$28 sps:$4 sm:$0xff]   ;;  %v2733_v21 = vmov 0  }
  0x74   :  { %1490 = vmatprep.subr.bf16.mxu0 %v2545_v23  ;;  %v2615_v22 = vld [vmem:[#allocation2 + $0x8] ss:$28 sps:$4 sm:$0xff]   ;;  %v2618_v23 = vld [vmem:[#allocation2 + $0x18] ss:$28 sps:$4 sm:$0xff]  }
  0x75   :  { %1245 = vmatpush1.bf16.msra.mxu1 %v2516_v24  ;;  %v2619_v24 = vld [vmem:[#allocation2 + $0x44] ss:$28 sps:$4 sm:$0xff]  }
  0x76   :  { %1246 = vmatprep.subr.bf16.mxu1 %v2527_v26  ;;  %v2622_v26 = vld [vmem:[#allocation2 + $0x50] ss:$28 sps:$4 sm:$0xff]  }
  0x77   :  { %1491 = vmatpush1.bf16.msra.mxu0 %v2543_v28  ;;  %v2625_v28 = vld [vmem:[#allocation2 + $0x78] ss:$28 sps:$4 sm:$0xff]  }
  0x78   :  { %1168 = vmatmul.mubr.bf16.gmra.mrb[8].mxu1 %v2523_v25  ;;  %1492 = vmatprep.subr.bf16.mxu0 %v2560_v33  ;;  %v2621_v25 = vld [vmem:[#allocation2 + $0x40] ss:$28 sps:$4 sm:$0xff]   ;;  %v2631_v33 = vld [vmem:[#allocation2 + $0xec] ss:$28 sps:$4 sm:$0xff]  }
  0x79   :  { %1414 = vmatmul.mubr.bf16.gmra.mrb[8].mxu0 %v2524_v27  ;;  %1247 = vmatpush1.bf16.msra.mxu1 %v2525_v29  ;;  %v2623_v27 = vld [vmem:[#allocation2 + $0x7c] ss:$28 sps:$4 sm:$0xff]   ;;  %v2626_v29 = vld [vmem:[#allocation2 + $0x88] ss:$28 sps:$4 sm:$0xff]  }
  0x7a   :  { %1177 = vmatprep.mubr.bf16.mxu1 %v2531_v30  ;;  %1248 = vmatprep.subr.bf16.mxu1 %v2535_v31  ;;  %v2627_v30 = vld [vmem:[#allocation2 + $0xb4] ss:$28 sps:$4 sm:$0xff]  }
  0x7b   :  { %1423 = vmatprep.mubr.bf16.mxu0 %v2536_v32  ;;  %1493 = vmatpush1.bf16.msra.mxu0 %v2558_v35  ;;  %v2629_v31 = vld [vmem:[#allocation2 + $0xb0] ss:$28 sps:$4 sm:$0xff]   ;;  %v2630_v32 = vld [vmem:[#allocation2 + $0xc0] ss:$28 sps:$4 sm:$0xff]   ;;  %v2634_v35 = vld [vmem:[#allocation2 + $0xf8] ss:$28 sps:$4 sm:$0xff]  }
  0x7c   :  { %1494 = vmatprep.subr.bf16.mxu0 %v2575_v36  ;;  %v2635_v36 = vld [vmem:[#allocation2 + $0x124] ss:$28 sps:$4 sm:$0xff]  }
  0x7d   :  { %1249 = vmatpush1.bf16.msra.mxu1 %v2533_v34  ;;  %v2633_v34 = vld [vmem:[#allocation2 + $0xe8] ss:$28 sps:$4 sm:$0xff]  }
  0x7e   :  { %1250 = vmatprep.subr.bf16.mxu1 %v2542_v37  ;;  %v2637_v37 = vld [vmem:[#allocation2 + $0x120] ss:$28 sps:$4 sm:$0xff]  }
  0x7f   :  { %1495 = vmatpush1.bf16.msra.mxu0 %v2573_v44  ;;  %v2646_v44 = vld [vmem:[#allocation2 + $0x1a0] ss:$28 sps:$4 sm:$0xff]  }
  0x80   :  { %1178 = vmatmul.mubr.bf16.gmra.mrb[12].mxu1 %v2538_v38  ;;  %1496 = vmatprep.subr.bf16.mxu0 %v2590_v45  ;;  %v2638_v38 = vld [vmem:[#allocation2 + $0x130] ss:$28 sps:$4 sm:$0xff]  }
  0x81   :  { %1424 = vmatmul.mubr.bf16.gmra.mrb[12].mxu0 %v2539_v39  ;;  %1251 = vmatpush1.bf16.msra.mxu1 %v2540_v40  ;;  %v2639_v39 = vld [vmem:[#allocation2 + $0x15c] ss:$28 sps:$4 sm:$0xff]   ;;  %v2647_v45 = vld [vmem:[#allocation2 + $0x1cc] ss:$28 sps:$4 sm:$0xff]  }
  0x82   :  { %1187 = vmatprep.mubr.bf16.mxu1 %v2546_v41  ;;  %1433 = vmatprep.mubr.bf16.mxu0 %v2548_v42  ;;  %v2641_v40 = vld [vmem:[#allocation2 + $0x158] ss:$28 sps:$4 sm:$0xff]   ;;  %v2642_v41 = vld [vmem:[#allocation2 + $0x168] ss:$28 sps:$4 sm:$0xff]  }
  0x83   :  { %1252 = vmatprep.subr.bf16.mxu1 %v2553_v43  ;;  %1497 = vmatpush1.bf16.msra.mxu0 %v2588_v49  ;;  %v2643_v42 = vld [vmem:[#allocation2 + $0x194] ss:$28 sps:$4 sm:$0xff]  }
  0x84   :  { %1498 = vmatprep.subr.bf16.mxu0 %v2609_v55  ;;  %v2645_v43 = vld [vmem:[#allocation2 + $0x190] ss:$28 sps:$4 sm:$0xff]  }
  0x85   :  { %1253 = vmatpush1.bf16.msra.mxu1 %v2551_v46  ;;  %v2649_v46 = vld [vmem:[#allocation2 + $0x1c8] ss:$28 sps:$4 sm:$0xff]  }
  0x86   :  { %1254 = vmatprep.subr.bf16.mxu1 %v2557_v48 }
  0x87   :  { %1499 = vmatpush1.bf16.msra.mxu0 %v2607_v56 }
  0x88   :  { %1188 = vmatmul.mubr.bf16.gmra.mrb[16].mxu1 %v2550_v47  ;;  %v2650_v47 = vld [vmem:[#allocation2 + $0x1d8] ss:$28 sps:$4 sm:$0xff]  }
  0x89   :  { %1434 = vmatmul.mubr.bf16.gmra.mrb[16].mxu0 %v2554_v50  ;;  %1255 = vmatpush1.bf16.msra.mxu1 %v2555_v51 }
  0x8a   :  { %1197 = vmatprep.mubr.bf16.mxu1 %v2561_v52  ;;  %1443 = vmatprep.mubr.bf16.mxu0 %v2563_v53 }
  0x8b   :  { %1256 = vmatprep.subr.bf16.mxu1 %v2569_v54 }
  0x8d   :  { %1257 = vmatpush1.bf16.msra.mxu1 %v2567_v57 }
  0x8e   :  { %1258 = vmatprep.subr.bf16.mxu1 %v2572_v59 }
  0x90   :  { %1198 = vmatmul.mubr.bf16.gmra.mrb[20].mxu1 %v2565_v58 }
  0x91   :  { %1444 = vmatmul.mubr.bf16.gmra.mrb[20].mxu0 %v2566_v60  ;;  %1259 = vmatpush1.bf16.msra.mxu1 %v2570_v61 }
  0x92   :  { %1207 = vmatprep.mubr.bf16.mxu1 %v2576_v62  ;;  %1453 = vmatprep.mubr.bf16.mxu0 %v2578_v63 }
  0x93   :  { %1260 = vmatprep.subr.bf16.mxu1 %v2584_v0 }
  0x95   :  { %1261 = vmatpush1.bf16.msra.mxu1 %v2582_v1 }
  0x96   :  { %1262 = vmatprep.subr.bf16.mxu1 %v2587_v2 }
  0x98   :  { %1208 = vmatmul.mubr.bf16.gmra.mrb[24].mxu1 %v2580_v3 }
  0x99   :  { %1454 = vmatmul.mubr.bf16.gmra.mrb[24].mxu0 %v2581_v4  ;;  %1217 = vmatprep.mubr.bf16.mxu1 %v2591_v6 }
  0x9a   :  { %1263 = vmatpush1.bf16.msra.mxu1 %v2585_v5  ;;  %1463 = vmatprep.mubr.bf16.mxu0 %v2593_v7 }
  0x9b   :  { %1264 = vmatprep.subr.bf16.mxu1 %v2599_v8 }
  0x9e   :  { %1265 = vmatpush1.bf16.msra.mxu1 %v2597_v9 }
  0x9f   :  { %1266 = vmatprep.subr.bf16.mxu1 %v2604_v10 }
  0xa0   :  { %1218 = vmatmul.mubr.bf16.gmra.mrb[28].mxu1 %v2595_v11 }
  0xa1   :  { %1464 = vmatmul.mubr.bf16.gmra.mrb[28].mxu0 %v2596_v12  ;;  %1227 = vmatprep.mubr.bf16.mxu1 %v2600_v13 }
  0xa2   :  { %1473 = vmatprep.mubr.bf16.mxu0 %v2605_v14  ;;  %1267 = vmatpush1.bf16.msra.mxu1 %v2602_v15 }
  0xa3   :  { %1268 = vmatprep.subr.bf16.mxu1 %v2614_v16 }
  0xa6   :  { %1269 = vmatpush1.bf16.msra.mxu1 %v2612_v17 }
  0xa8   :  { %1228 = vmatmul.mubr.bf16.gmra.mrb[32].mxu1 %v2610_v18 }
  0xa9   :  { %1474 = vmatmul.mubr.bf16.gmra.mrb[32].mxu0 %v2611_v19  ;;  %1270 = vmatprep.mubr.bf16.mxu1 %v2617_v20 }
  0xaa   :  { %1516 = vmatprep.mubr.bf16.mxu0 %v2733_v21 }
  0xb0   :  { %1271 = vmatmul.mubr.bf16.vlgmr.msra.gmra.mrb[0].mxu1 %v2615_v22 }
  0xb1   :  { %1517 = vmatmul.mubr.bf16.vlgmr.msra.gmra.mrb[0].mxu0 %v2618_v23  ;;  %1280 = vmatprep.mubr.bf16.mxu1 %v2619_v24 }
  0xb2   :  { %1526 = vmatprep.mubr.bf16.mxu0 %v2733_v21 }
  0xb8   :  { %1281 = vmatmul.mubr.bf16.gmra.mrb[4].mxu1 %v2621_v25 }
  0xb9   :  { %1527 = vmatmul.mubr.bf16.gmra.mrb[4].mxu0 %v2622_v26  ;;  %1290 = vmatprep.mubr.bf16.mxu1 %v2623_v27 }
  0xba   :  { %1536 = vmatprep.mubr.bf16.mxu0 %v2733_v21 }
  0xc0   :  { %1291 = vmatmul.mubr.bf16.gmra.mrb[8].mxu1 %v2625_v28 }
  0xc1   :  { %1537 = vmatmul.mubr.bf16.gmra.mrb[8].mxu0 %v2626_v29  ;;  %1300 = vmatprep.mubr.bf16.mxu1 %v2627_v30 }
  0xc2   :  { %1546 = vmatprep.mubr.bf16.mxu0 %v2733_v21 }
  0xc8   :  { %1301 = vmatmul.mubr.bf16.gmra.mrb[12].mxu1 %v2629_v31 }
  0xc9   :  { %1547 = vmatmul.mubr.bf16.gmra.mrb[12].mxu0 %v2630_v32  ;;  %1310 = vmatprep.mubr.bf16.mxu1 %v2631_v33 }
  0xca   :  { %1556 = vmatprep.mubr.bf16.mxu0 %v2733_v21 }
  0xd0   :  { %1311 = vmatmul.mubr.bf16.gmra.mrb[16].mxu1 %v2633_v34 }
  0xd1   :  { %1557 = vmatmul.mubr.bf16.gmra.mrb[16].mxu0 %v2634_v35  ;;  %1320 = vmatprep.mubr.bf16.mxu1 %v2635_v36 }
  0xd2   :  { %1566 = vmatprep.mubr.bf16.mxu0 %v2733_v21 }
  0xd8   :  { %1321 = vmatmul.mubr.bf16.gmra.mrb[20].mxu1 %v2637_v37 }
  0xd9   :  { %1567 = vmatmul.mubr.bf16.gmra.mrb[20].mxu0 %v2638_v38  ;;  %1330 = vmatprep.mubr.bf16.mxu1 %v2639_v39 }
  0xda   :  { %1576 = vmatprep.mubr.bf16.mxu0 %v2733_v21 }
  0xe0   :  { %1331 = vmatmul.mubr.bf16.gmra.mrb[24].mxu1 %v2641_v40 }
  0xe1   :  { %1577 = vmatmul.mubr.bf16.gmra.mrb[24].mxu0 %v2642_v41  ;;  %1340 = vmatprep.mubr.bf16.mxu1 %v2643_v42 }
  0xe2   :  { %1586 = vmatprep.mubr.bf16.mxu0 %v2733_v21 }
  0xe8   :  { %1341 = vmatmul.mubr.bf16.gmra.mrb[28].mxu1 %v2645_v43 }
  0xe9   :  { %1587 = vmatmul.mubr.bf16.gmra.mrb[28].mxu0 %v2646_v44  ;;  %1350 = vmatprep.mubr.bf16.mxu1 %v2647_v45 }
  0xea   :  { %1596 = vmatprep.mubr.bf16.mxu0 %v2733_v21 }
  0xf0   :  { %1351 = vmatmul.mubr.bf16.gmra.mrb[32].mxu1 %v2649_v46 }
  0xf1   :  { %1597 = vmatmul.mubr.bf16.gmra.mrb[32].mxu0 %v2650_v47 }
 0x183   :  { %v1272_v48 = vpop.f32.mrb[0].mxu1 }
 0x184   :  { %v1518_v49 = vpop.f32.mrb[0].mxu0  ;;  %v1274_v51 = vpop.f32.mrb[1].mxu1 }
 0x185   :  { %v2788_v50 = vadd.f32 %v1518_v49, %v1272_v48  ;;  %v1520_v52 = vpop.f32.mrb[1].mxu0  ;;  %v1276_v54 = vpop.f32.mrb[2].mxu1 }
 0x186   :  { %v2790_v53 = vadd.f32 %v1520_v52, %v1274_v51  ;;  %v1522_v55 = vpop.f32.mrb[2].mxu0  ;;  %v1278_v57 = vpop.f32.mrb[3].mxu1 }
 0x187   :  { %v2792_v56 = vadd.f32 %v1522_v55, %v1276_v54  ;;  %v1524_v58 = vpop.f32.mrb[3].mxu0  ;;  %v1653_v25 = vmul.f32 %v2788_v50, %v2788_v50 }
 0x188   :  { %v2794_v59 = vadd.f32 %v1524_v58, %v1278_v57  ;;  %v1654_v22 = vmul.f32 %v2790_v53, %v2790_v53 }
 0x189   :  { %v1655_v21 = vmul.f32 %v2792_v56, %v2792_v56  ;;  %v1607_v26 = vadd.f32 %v2792_v56, %v2788_v50 }
 0x18a   :  { %v1656_v19 = vmul.f32 %v2794_v59, %v2794_v59  ;;  %v1630_v23 = vadd.f32 %v2794_v59, %v2790_v53 }
 0x18b   :  { %v1282_v60 = vpop.f32.mrb[4].mxu1  ;;  %v1689_v32 = vadd.f32 %v1655_v21, %v1653_v25 }
 0x18c   :  { %v1528_v61 = vpop.f32.mrb[4].mxu0  ;;  %v1284_v63 = vpop.f32.mrb[5].mxu1  ;;  %v1712_v28 = vadd.f32 %v1656_v19, %v1654_v22 }
 0x18d   :  { %v2796_v62 = vadd.f32 %v1528_v61, %v1282_v60  ;;  %v1530_v0 = vpop.f32.mrb[5].mxu0  ;;  %v1286_v2 = vpop.f32.mrb[6].mxu1 }
 0x18e   :  { %v2798_v1 = vadd.f32 %v1530_v0, %v1284_v63  ;;  %v1532_v3 = vpop.f32.mrb[6].mxu0  ;;  %v1288_v5 = vpop.f32.mrb[7].mxu1 }
 0x18f   :  { %v2800_v4 = vadd.f32 %v1532_v3, %v1286_v2  ;;  %v1534_v6 = vpop.f32.mrb[7].mxu0  ;;  %v1657_v27 = vmul.f32 %v2796_v62, %v2796_v62  ;;  %v1608_v33 = vadd.f32 %v2796_v62, %v1607_v26 }
 0x190   :  { %v2802_v7 = vadd.f32 %v1534_v6, %v1288_v5  ;;  %v1658_v24 = vmul.f32 %v2798_v1, %v2798_v1  ;;  %v1631_v29 = vadd.f32 %v2798_v1, %v1630_v23 }
 0x191   :  { %v1690_v42 = vadd.f32 %v1689_v32, %v1657_v27  ;;  %v1659_v43 = vmul.f32 %v2800_v4, %v2800_v4  ;;  %v1609_v51 = vadd.f32 %v2800_v4, %v1608_v33 }
 0x192   :  { %v1713_v37 = vadd.f32 %v1712_v28, %v1658_v24  ;;  %v1660_v38 = vmul.f32 %v2802_v7, %v2802_v7  ;;  %v1632_v47 = vadd.f32 %v2802_v7, %v1631_v29 }
 0x193   :  { %v1292_v8 = vpop.f32.mrb[8].mxu1  ;;  %v1691_v57 = vadd.f32 %v1690_v42, %v1659_v43 }
 0x194   :  { %v1538_v9 = vpop.f32.mrb[8].mxu0  ;;  %v1294_v11 = vpop.f32.mrb[9].mxu1  ;;  %v1714_v54 = vadd.f32 %v1713_v37, %v1660_v38 }
 0x195   :  { %v2804_v10 = vadd.f32 %v1538_v9, %v1292_v8  ;;  %v1540_v12 = vpop.f32.mrb[9].mxu0  ;;  %v1296_v14 = vpop.f32.mrb[10].mxu1 }
 0x196   :  { %v2806_v13 = vadd.f32 %v1540_v12, %v1294_v11  ;;  %v1542_v15 = vpop.f32.mrb[10].mxu0  ;;  %v1298_v17 = vpop.f32.mrb[11].mxu1 }
 0x197   :  { %v2808_v16 = vadd.f32 %v1542_v15, %v1296_v14  ;;  %v1544_v18 = vpop.f32.mrb[11].mxu0  ;;  %v1661_v52 = vmul.f32 %v2804_v10, %v2804_v10  ;;  %v1610_v58 = vadd.f32 %v2804_v10, %v1609_v51 }
 0x198   :  { %v2812_v20 = vadd.f32 %v1544_v18, %v1298_v17  ;;  %v1662_v48 = vmul.f32 %v2806_v13, %v2806_v13  ;;  %v1633_v55 = vadd.f32 %v2806_v13, %v1632_v47 }
 0x199   :  { %v1692_v2 = vadd.f32 %v1691_v57, %v1661_v52  ;;  %v1663_v3 = vmul.f32 %v2808_v16, %v2808_v16  ;;  %v1611_v17 = vadd.f32 %v2808_v16, %v1610_v58 }
 0x19a   :  { %v1715_v60 = vadd.f32 %v1714_v54, %v1662_v48  ;;  %v1664_v61 = vmul.f32 %v2812_v20, %v2812_v20  ;;  %v1634_v9 = vadd.f32 %v2812_v20, %v1633_v55 }
 0x19b   :  { %v1302_v30 = vpop.f32.mrb[12].mxu1  ;;  %v1693_v26 = vadd.f32 %v1692_v2, %v1663_v3 }
 0x19c   :  { %v1548_v31 = vpop.f32.mrb[12].mxu0  ;;  %v1304_v35 = vpop.f32.mrb[13].mxu1  ;;  %v1716_v23 = vadd.f32 %v1715_v60, %v1664_v61 }
 0x19d   :  { %v2830_v34 = vadd.f32 %v1548_v31, %v1302_v30  ;;  %v1550_v36 = vpop.f32.mrb[13].mxu0  ;;  %v1306_v40 = vpop.f32.mrb[14].mxu1 }
 0x19e   :  { %v2834_v39 = vadd.f32 %v1550_v36, %v1304_v35  ;;  %v1552_v41 = vpop.f32.mrb[14].mxu0  ;;  %v1308_v45 = vpop.f32.mrb[15].mxu1 }
 0x19f   :  { %v2838_v44 = vadd.f32 %v1552_v41, %v1306_v40  ;;  %v1554_v46 = vpop.f32.mrb[15].mxu0  ;;  %v1665_v18 = vmul.f32 %v2830_v34, %v2830_v34  ;;  %v1612_v27 = vadd.f32 %v2830_v34, %v1611_v17 }
 0x1a0   :  { %v2843_v49 = vadd.f32 %v1554_v46, %v1308_v45  ;;  %v1666_v11 = vmul.f32 %v2834_v39, %v2834_v39  ;;  %v1635_v24 = vadd.f32 %v2834_v39, %v1634_v9 }
 0x1a1   :  { %v1694_v30 = vadd.f32 %v1693_v26, %v1665_v18  ;;  %v1667_v31 = vmul.f32 %v2838_v44, %v2838_v44  ;;  %v1613_v37 = vadd.f32 %v2838_v44, %v1612_v27 }
 0x1a2   :  { %v1717_v28 = vadd.f32 %v1716_v23, %v1666_v11  ;;  %v1668_v29 = vmul.f32 %v2843_v49, %v2843_v49  ;;  %v1636_v32 = vadd.f32 %v2843_v49, %v1635_v24 }
 0x1a3   :  { %v1312_v63 = vpop.f32.mrb[16].mxu1  ;;  %v1695_v51 = vadd.f32 %v1694_v30, %v1667_v31 }
 0x1a4   :  { %v1558_v0 = vpop.f32.mrb[16].mxu0  ;;  %v1314_v6 = vpop.f32.mrb[17].mxu1  ;;  %v1718_v43 = vadd.f32 %v1717_v28, %v1668_v29 }
 0x1a5   :  { %v2854_v5 = vadd.f32 %v1558_v0, %v1312_v63  ;;  %v1560_v8 = vpop.f32.mrb[17].mxu0  ;;  %v1316_v14 = vpop.f32.mrb[18].mxu1 }
 0x1a6   :  { %v2859_v12 = vadd.f32 %v1560_v8, %v1314_v6  ;;  %v1562_v15 = vpop.f32.mrb[18].mxu0  ;;  %v1318_v21 = vpop.f32.mrb[19].mxu1 }
 0x1a7   :  { %v2864_v19 = vadd.f32 %v1562_v15, %v1316_v14  ;;  %v1564_v22 = vpop.f32.mrb[19].mxu0  ;;  %v1669_v38 = vmul.f32 %v2854_v5, %v2854_v5  ;;  %v1614_v52 = vadd.f32 %v2854_v5, %v1613_v37 }
 0x1a8   :  { %v2867_v25 = vadd.f32 %v1564_v22, %v1318_v21  ;;  %v1670_v33 = vmul.f32 %v2859_v12, %v2859_v12  ;;  %v1637_v45 = vadd.f32 %v2859_v12, %v1636_v32 }
 0x1a9   :  { %v1696_v63 = vadd.f32 %v1695_v51, %v1669_v38  ;;  %v1671_v0 = vmul.f32 %v2864_v19, %v2864_v19  ;;  %v1615_v6 = vadd.f32 %v2864_v19, %v1614_v52 }
 0x1aa   :  { %v1719_v58 = vadd.f32 %v1718_v43, %v1670_v33  ;;  %v1672_v60 = vmul.f32 %v2867_v25, %v2867_v25  ;;  %v1638_v2 = vadd.f32 %v2867_v25, %v1637_v45 }
 0x1ab   :  { %v1322_v35 = vpop.f32.mrb[20].mxu1  ;;  %v1697_v17 = vadd.f32 %v1696_v63, %v1671_v0 }
 0x1ac   :  { %v1568_v36 = vpop.f32.mrb[20].mxu0  ;;  %v1324_v41 = vpop.f32.mrb[21].mxu1  ;;  %v1720_v9 = vadd.f32 %v1719_v58, %v1672_v60 }
 0x1ad   :  { %v2880_v40 = vadd.f32 %v1568_v36, %v1322_v35  ;;  %v1570_v42 = vpop.f32.mrb[21].mxu0  ;;  %v1326_v47 = vpop.f32.mrb[22].mxu1 }
 0x1ae   :  { %v2883_v46 = vadd.f32 %v1570_v42, %v1324_v41  ;;  %v1572_v48 = vpop.f32.mrb[22].mxu0  ;;  %v1328_v55 = vpop.f32.mrb[23].mxu1 }
 0x1af   :  { %v2886_v54 = vadd.f32 %v1572_v48, %v1326_v47  ;;  %v1574_v57 = vpop.f32.mrb[23].mxu0  ;;  %v1673_v8 = vmul.f32 %v2880_v40, %v2880_v40  ;;  %v1616_v18 = vadd.f32 %v2880_v40, %v1615_v6 }
 0x1b0   :  { %v2890_v61 = vadd.f32 %v1574_v57, %v1328_v55  ;;  %v1674_v3 = vmul.f32 %v2883_v46, %v2883_v46  ;;  %v1639_v11 = vadd.f32 %v2883_v46, %v1638_v2 }
 0x1b1   :  { %v1698_v30 = vadd.f32 %v1697_v17, %v1673_v8  ;;  %v1675_v31 = vmul.f32 %v2886_v54, %v2886_v54  ;;  %v1617_v41 = vadd.f32 %v2886_v54, %v1616_v18 }
 0x1b2   :  { %v1721_v24 = vadd.f32 %v1720_v9, %v1674_v3  ;;  %v1676_v26 = vmul.f32 %v2890_v61, %v2890_v61  ;;  %v1640_v36 = vadd.f32 %v2890_v61, %v1639_v11 }
 0x1b3   :  { %v1332_v14 = vpop.f32.mrb[24].mxu1  ;;  %v1699_v47 = vadd.f32 %v1698_v30, %v1675_v31 }
 0x1b4   :  { %v1578_v15 = vpop.f32.mrb[24].mxu0  ;;  %v1334_v22 = vpop.f32.mrb[25].mxu1  ;;  %v1722_v43 = vadd.f32 %v1721_v24, %v1676_v26 }
 0x1b5   :  { %v2902_v21 = vadd.f32 %v1578_v15, %v1332_v14  ;;  %v1580_v23 = vpop.f32.mrb[25].mxu0  ;;  %v1336_v28 = vpop.f32.mrb[26].mxu1 }
 0x1b6   :  { %v2906_v27 = vadd.f32 %v1580_v23, %v1334_v22  ;;  %v1582_v29 = vpop.f32.mrb[26].mxu0  ;;  %v1338_v33 = vpop.f32.mrb[27].mxu1 }
 0x1b7   :  { %v2910_v32 = vadd.f32 %v1582_v29, %v1336_v28  ;;  %v1584_v35 = vpop.f32.mrb[27].mxu0  ;;  %v1677_v42 = vmul.f32 %v2902_v21, %v2902_v21  ;;  %v1618_v48 = vadd.f32 %v2902_v21, %v1617_v41 }
 0x1b8   :  { %v1678_v37 = vmul.f32 %v2906_v27, %v2906_v27  ;;  %v2915_v38 = vadd.f32 %v1584_v35, %v1338_v33  ;;  %v1641_v45 = vadd.f32 %v2906_v27, %v1640_v36 }
 0x1b9   :  { %v1700_v58 = vadd.f32 %v1699_v47, %v1677_v42  ;;  %v1679_v60 = vmul.f32 %v2910_v32, %v2910_v32  ;;  %v1619_v11 = vadd.f32 %v2910_v32, %v1618_v48 }
 0x1ba   :  { %v1723_v51 = vadd.f32 %v1722_v43, %v1678_v37  ;;  %v1680_v52 = vmul.f32 %v2915_v38, %v2915_v38  ;;  %v1642_v3 = vadd.f32 %v2915_v38, %v1641_v45 }
 0x1bb   :  { %v1342_v55 = vpop.f32.mrb[28].mxu1  ;;  %v1701_v28 = vadd.f32 %v1700_v58, %v1679_v60 }
 0x1bc   :  { %v1588_v57 = vpop.f32.mrb[28].mxu0  ;;  %v1344_v0 = vpop.f32.mrb[29].mxu1  ;;  %v1724_v22 = vadd.f32 %v1723_v51, %v1680_v52 }
 0x1bd   :  { %v2926_v63 = vadd.f32 %v1588_v57, %v1342_v55  ;;  %v1590_v2 = vpop.f32.mrb[29].mxu0  ;;  %v1346_v8 = vpop.f32.mrb[30].mxu1 }
 0x1be   :  { %v2929_v6 = vadd.f32 %v1590_v2, %v1344_v0  ;;  %v1592_v9 = vpop.f32.mrb[30].mxu0  ;;  %v1348_v17 = vpop.f32.mrb[31].mxu1 }
 0x1bf   :  { %v1681_v14 = vmul.f32 %v2926_v63, %v2926_v63  ;;  %v2934_v15 = vadd.f32 %v1592_v9, %v1346_v8  ;;  %v1594_v18 = vpop.f32.mrb[31].mxu0  ;;  %v1620_v29 = vadd.f32 %v2926_v63, %v1619_v11 }
 0x1c0   :  { %v1643_v23 = vadd.f32 %v2929_v6, %v1642_v3  ;;  %v1682_v24 = vmul.f32 %v2929_v6, %v2929_v6  ;;  %v2939_v26 = vadd.f32 %v1594_v18, %v1348_v17 }
 0x1c1   :  { %v1702_v35 = vadd.f32 %v1701_v28, %v1681_v14  ;;  %v1683_v36 = vmul.f32 %v2934_v15, %v2934_v15  ;;  %v1621_v43 = vadd.f32 %v2934_v15, %v1620_v29 }
 0x1c2   :  { %v1725_v30 = vadd.f32 %v1724_v22, %v1682_v24  ;;  %v1644_v31 = vadd.f32 %v2939_v26, %v1643_v23  ;;  %v1684_v33 = vmul.f32 %v2939_v26, %v2939_v26 }
 0x1c3   :  { %v1352_v41 = vpop.f32.mrb[32].mxu1  ;;  %v1703_v57 = vadd.f32 %v1702_v35, %v1683_v36 }
 0x1c4   :  { %v1726_v37 = vadd.f32 %v1725_v30, %v1684_v33  ;;  %v1598_v42 = vpop.f32.mrb[32].mxu0  ;;  %v1354_v47 = vpop.f32.mrb[33].mxu1 }
 0x1c5   :  { %v2948_v45 = vadd.f32 %v1598_v42, %v1352_v41  ;;  %v1600_v48 = vpop.f32.mrb[33].mxu0  ;;  %v1356_v52 = vpop.f32.mrb[34].mxu1 }
 0x1c6   :  { %v2950_v51 = vadd.f32 %v1600_v48, %v1354_v47  ;;  %v1602_v55 = vpop.f32.mrb[34].mxu0  ;;  %v1358_v2 = vpop.f32.mrb[35].mxu1 }
 0x1c7   :  { %v1622_v58 = vadd.f32 %v2948_v45, %v1621_v43  ;;  %v1685_v60 = vmul.f32 %v2948_v45, %v2948_v45  ;;  %v2955_v0 = vadd.f32 %v1602_v55, %v1356_v52  ;;  %v1604_v3 = vpop.f32.mrb[35].mxu0 }
 0x1c8   :  { %v1645_v8 = vadd.f32 %v2950_v51, %v1644_v31  ;;  %v1686_v9 = vmul.f32 %v2950_v51, %v2950_v51  ;;  %v2960_v11 = vadd.f32 %v1604_v3, %v1358_v2 }
 0x1c9   :  { %v1704_v14 = vadd.f32 %v1703_v57, %v1685_v60  ;;  %v1623_v17 = vadd.f32 %v2955_v0, %v1622_v58  ;;  %v1687_v18 = vmul.f32 %v2955_v0, %v2955_v0 }
 0x1ca   :  { %v1727_v22 = vadd.f32 %v1726_v37, %v1686_v9  ;;  %v1646_v23 = vadd.f32 %v2960_v11, %v1645_v8  ;;  %v1688_v24 = vmul.f32 %v2960_v11, %v2960_v11 }
 0x1cb   :  { %v1624_v28 = vrot.slane %v1623_v17, 4  ;;  %v1705_v29 = vadd.f32 %v1704_v14, %v1687_v18 }
 0x1cc   :  { %v1647_v30 = vrot.slane %v1646_v23, 4  ;;  %v1728_v31 = vadd.f32 %v1727_v22, %v1688_v24 }
 0x1cd   :  { %v1625_v33 = vadd.f32 %v1624_v28, %v1623_v17  ;;  %v1706_v35 = vrot.slane %v1705_v29, 4 }
 0x1ce   :  { %v1648_v36 = vadd.f32 %v1647_v30, %v1646_v23  ;;  %v1729_v41 = vrot.slane %v1728_v31, 4 }
 0x1cf   :  { %v1626_v42 = vrot.slane %v1625_v33, 2  ;;  %v1707_v43 = vadd.f32 %v1706_v35, %v1705_v29 }
 0x1d0   :  { %v1649_v47 = vrot.slane %v1648_v36, 2  ;;  %v1730_v48 = vadd.f32 %v1729_v41, %v1728_v31 }
 0x1d1   :  { %v1627_v52 = vadd.f32 %v1626_v42, %v1625_v33  ;;  %v1708_v55 = vrot.slane %v1707_v43, 2 }
 0x1d2   :  { %v1650_v37 = vadd.f32 %v1649_v47, %v1648_v36  ;;  %v1731_v57 = vrot.slane %v1730_v48, 2  ;;  %v2734_v47 = vmov 1966171168  }
 0x1d3   :  { %v1628_v58 = vrot.slane %v1627_v52, 1  ;;  %v1709_v60 = vadd.f32 %v1708_v55, %v1707_v43 }
 0x1d4   :  { %v1651_v2 = vrot.slane %v1650_v37, 1  ;;  %v1732_v3 = vadd.f32 %v1731_v57, %v1730_v48  ;;  %v1754_v48 = vunpack.c.l.s4 %v2734_v47 }
 0x1d5   :  { %v1629_v8 = vadd.f32 %v1628_v58, %v1627_v52  ;;  %v1710_v9 = vrot.slane %v1709_v60, 1  ;;  %v1756_v52 = vlaneseq }
 0x1d6   :  { %v1652_v14 = vadd.f32 %v1651_v2, %v1650_v37  ;;  %v1733_v18 = vrot.slane %v1732_v3, 1  ;;  %v1755_v55 = vunpack.c.0.s8 %v1754_v48 }
 0x1d7   :  { %v1711_v17 = vadd.f32 %v1710_v9, %v1709_v60  ;;  %v1735_v22 = vmul.f32 0.0069444445, %v1629_v8  ;;  %v1757_v37 = vshrl.u32 %v1756_v52, 7  ;;  %v1745_v8 = vld [vmem:[%s3090_s2] sm:$0x3] }
 0x1d8   :  { %v1734_v23 = vadd.f32 %v1733_v18, %v1732_v3  ;;  %v1736_v24 = vmul.f32 0.0069444445, %v1652_v14 }
 0x1d9   :  { %v1737_v28 = vmul.f32 0.0069444445, %v1711_v17  ;;  %v1739_v29 = vmul.f32 %v1735_v22, %v1735_v22  ;;  %v1758_v58 = vsub.s32 %v1755_v55, %v1757_v37  ;;  %v1773_v14 = vsub.s32 0, %v1757_v37 }
 0x1da   :  { %v1738_v30 = vmul.f32 0.0069444445, %v1734_v23  ;;  %v1740_v31 = vmul.f32 %v1736_v24, %v1736_v24  ;;  %v1777_v18 = vsub.s32 1, %v1757_v37 }
 0x1db   :  { %v1741_v33 = vsub.f32 %v1737_v28, %v1739_v29 }
 0x1dc   :  { %v1742_v35 = vsub.f32 %v1738_v30, %v1740_v31 }
 0x1dd   :  { %v1743_v36 = vmax.f32 %v1741_v33, 0.0 }
 0x1de   :  { %v1744_v41 = vmax.f32 %v1742_v35, 0.0 }
 0x1df   :  { %v1746_v42 = vadd.f32 0.001, %v1743_v36 }
 0x1e0   :  { %v1747_v43 = vadd.f32 0.001, %v1744_v41 }
 0x1e1   :  { %2651 = vrsqrt.f32 %v1746_v42 }
 0x1e2   :  { %2653 = vrsqrt.f32 %v1747_v43 }
 0x1eb   :  { %v2652_v57 = vpop.eup %2651 }
 0x1ec   :  { %v2654_v60 = vpop.eup %2653 }
 0x1ed   :  { %v1752_v2 = vcombine.low %v2652_v57, %v2654_v60 }
 0x1ef   :  { %v1759_v3 = vrot.slane %v1752_v2, %v1758_v58 }
 0x1f1   :  { %v1766_v9 = vrot.slane %v1759_v3, %v1758_v58 }
 0x1f3   :  { %v1768_v17 = vmul.f32 %v1766_v9, %v1745_v8 }
 0x1f5   :  { %v1774_v23 = vrot.slane %v1768_v17, %v1773_v14  ;;  %v1778_v28 = vrot.slane %v1768_v17, %v1777_v18 }
 0x1f7   :  { %v1781_v29 = vmul.f32 %v1774_v23, %v1735_v22  ;;  %v1782_v30 = vmul.f32 %v1778_v28, %v1736_v24  ;;  %v1836_v31 = vmul.f32 %v2955_v0, %v1774_v23  ;;  %v1837_v33 = vmul.f32 %v2960_v11, %v1778_v28 }
 0x1f8   :  { %v1802_v36 = vmul.f32 %v2788_v50, %v1774_v23  ;;  %v1803_v41 = vmul.f32 %v2790_v53, %v1778_v28  ;;  %v1804_v42 = vmul.f32 %v2792_v56, %v1774_v23  ;;  %v1805_v43 = vmul.f32 %v2794_v59, %v1778_v28  ;;  %v1769_v50 = vld [vmem:[%s3091_s3] sm:$0x3]  ;;  %s2735_s3 = smov [#allocation7]  }
 0x1f9   :  { %v1785_v35 = vcombine.low %v1781_v29, %v1782_v30  ;;  %v1806_v47 = vmul.f32 %v2796_v62, %v1774_v23  ;;  %v1807_v48 = vmul.f32 %v2798_v1, %v1778_v28  ;;  %v1808_v22 = vmul.f32 %v2800_v4, %v1774_v23  ;;  %s2052_s18 = sshll.u32 %s2735_s3, 4  ;;  %s2053_s18 = int_to_ptr.vmem [resolvable:$true] %s2052_s18 }
 0x1fa   :  { %v1809_v0 = vmul.f32 %v2802_v7, %v1778_v28  ;;  %v1810_v11 = vmul.f32 %v2804_v10, %v1774_v23  ;;  %v1811_v52 = vmul.f32 %v2806_v13, %v1778_v28  ;;  %v1812_v53 = vmul.f32 %v2808_v16, %v1774_v23  ;;  %s2699_s19 = scalar_lea.vmem %s2053_s18, 2304  ;;  %p2704_p3 = scmp.lt.s32.totalorder %s2053_s18, %s2053_s18 }
 0x1fb   :  { %v1792_v24 = vrot.slane %v1785_v35, %v1758_v58  ;;  %v1813_v56 = vmul.f32 %v2812_v20, %v1778_v28  ;;  %v1814_v59 = vmul.f32 %v2830_v34, %v1774_v23  ;;  %v1815_v62 = vmul.f32 %v2834_v39, %v1778_v28  ;;  %p2700_p2 = scmp.ne.s32.totalorder %s2053_s18, %s2699_s19  ;;  %p2705_p4 = scmp.lt.s32.totalorder %s2699_s19, %s2699_s19 }
 0x1fc   :  { %v1816_v4 = vmul.f32 %v2838_v44, %v1774_v23  ;;  %v1817_v7 = vmul.f32 %v2843_v49, %v1778_v28  ;;  %v1818_v10 = vmul.f32 %v2854_v5, %v1774_v23  ;;  %v1819_v13 = vmul.f32 %v2859_v12, %v1778_v28 }
 0x1fd   :  { %v1799_v1 = vrot.slane %v1792_v24, %v1758_v58  ;;  %v1820_v55 = vmul.f32 %v2864_v19, %v1774_v23  ;;  %v1821_v37 = vmul.f32 %v2867_v25, %v1778_v28  ;;  %v1822_v16 = vmul.f32 %v2880_v40, %v1774_v23  ;;  %p2706_p5 = por %p2705_p4, %p2704_p3 }
 0x1fe   :  { %v1823_v34 = vmul.f32 %v2883_v46, %v1778_v28  ;;  %v1824_v39 = vmul.f32 %v2886_v54, %v1774_v23  ;;  %v1825_v57 = vmul.f32 %v2890_v61, %v1778_v28  ;;  %v1826_v44 = vmul.f32 %v2902_v21, %v1774_v23 }
 0x1ff   :  { %v1801_v20 = vsub.f32 %v1769_v50, %v1799_v1  ;;  %v1831_v49 = vmul.f32 %v2929_v6, %v1778_v28  ;;  %v1832_v5 = vmul.f32 %v2934_v15, %v1774_v23  ;;  %v1833_v12 = vmul.f32 %v2939_v26, %v1778_v28  ;;  %p2707_p6 = pnand %p2706_p5, %p2700_p2 }
 0x200   :  { %v1834_v25 = vmul.f32 %v2948_v45, %v1774_v23  ;;  %v1835_v40 = vmul.f32 %v2950_v51, %v1778_v28  ;;  %v1827_v46 = vmul.f32 %v2906_v27, %v1778_v28  ;;  %v1828_v54 = vmul.f32 %v2910_v32, %v1774_v23 }
 0x201   :  { %v1842_v19 = vrot.slane %v1801_v20, %v1773_v14  ;;  %v1846_v58 = vrot.slane %v1801_v20, %v1777_v18  ;;  %v1829_v61 = vmul.f32 %v2915_v38, %v1778_v28  ;;  %v1830_v21 = vmul.f32 %v2926_v63, %v1774_v23 }
 0x203   :  { %v1883_v60 = vadd.f32 %v1842_v19, %v1836_v31  ;;  %v1884_v6 = vadd.f32 %v1846_v58, %v1837_v33  ;;  %v3010_v2 = vadd.f32 %v1842_v19, %v1802_v36  ;;  %v3012_v15 = vadd.f32 %v1846_v58, %v1803_v41 }
 0x204   :  { %v3014_v26 = vadd.f32 %v1842_v19, %v1804_v42  ;;  %v3016_v3 = vadd.f32 %v1846_v58, %v1805_v43  ;;  %v3018_v45 = vadd.f32 %v1842_v19, %v1806_v47  ;;  %v3020_v51 = vadd.f32 %v1846_v58, %v1807_v48 }
 0x205   :  { %v1919_v27 = vmax.f32 %v1883_v60, 0.0  ;;  %v1920_v32 = vmax.f32 %v1884_v6, 0.0  ;;  %v3022_v8 = vadd.f32 %v1842_v19, %v1808_v22  ;;  %v3024_v38 = vadd.f32 %v1846_v58, %v1809_v0 }
 0x206   :  { %v3026_v63 = vadd.f32 %v1842_v19, %v1810_v11  ;;  %v3028_v9 = vadd.f32 %v1846_v58, %v1811_v52  ;;  %v3030_v14 = vadd.f32 %v1842_v19, %v1812_v53  ;;  %v3032_v18 = vadd.f32 %v1846_v58, %v1813_v56 }
 0x207   :  { %v2275_v17 = vpack.c.bf16 %v1920_v32, %v1919_v27  ;;  %v3034_v23 = vadd.f32 %v1842_v19, %v1814_v59  ;;  %v3036_v28 = vadd.f32 %v1846_v58, %v1815_v62  ;;  %v3038_v29 = vadd.f32 %v1842_v19, %v1816_v4 }
 0x208   :  { %v3040_v30 = vadd.f32 %v1846_v58, %v1817_v7  ;;  %v3042_v31 = vadd.f32 %v1842_v19, %v1818_v10  ;;  %v3044_v33 = vadd.f32 %v1846_v58, %v1819_v13  ;;  %v3046_v35 = vadd.f32 %v1842_v19, %v1820_v55 }
 0x209   :  { %2046 = vst [vmem:[#allocation7 + $0x88] sm:$0xff] %v2275_v17  ;;  %v1868_v36 = vadd.f32 %v1846_v58, %v1821_v37  ;;  %v1869_v41 = vadd.f32 %v1842_v19, %v1822_v16  ;;  %v1870_v42 = vadd.f32 %v1846_v58, %v1823_v34  ;;  %v3048_v43 = vadd.f32 %v1842_v19, %v1824_v39 }
 0x20a   :  { %v1872_v47 = vadd.f32 %v1846_v58, %v1825_v57  ;;  %v1873_v48 = vadd.f32 %v1842_v19, %v1826_v44  ;;  %v1874_v22 = vadd.f32 %v1846_v58, %v1827_v46  ;;  %v1875_v24 = vadd.f32 %v1842_v19, %v1828_v54 }
 0x20b   :  { %v1876_v0 = vadd.f32 %v1846_v58, %v1829_v61  ;;  %v1877_v11 = vadd.f32 %v1842_v19, %v1830_v21  ;;  %v1878_v52 = vadd.f32 %v1846_v58, %v1831_v49  ;;  %v3050_v50 = vadd.f32 %v1842_v19, %v1832_v5 }
 0x20c   :  { %v1880_v53 = vadd.f32 %v1846_v58, %v1833_v12  ;;  %v1881_v56 = vadd.f32 %v1842_v19, %v1834_v25  ;;  %v1882_v59 = vadd.f32 %v1846_v58, %v1835_v40  ;;  %v1885_v62 = vmax.f32 %v3010_v2, 0.0 }
 0x20d   :  { %v1886_v1 = vmax.f32 %v3012_v15, 0.0  ;;  %v1887_v4 = vmax.f32 %v3014_v26, 0.0  ;;  %v1888_v7 = vmax.f32 %v3016_v3, 0.0  ;;  %v1889_v10 = vmax.f32 %v3018_v45, 0.0 }
 0x20e   :  { %v1890_v13 = vmax.f32 %v3020_v51, 0.0  ;;  %v1891_v55 = vmax.f32 %v3022_v8, 0.0  ;;  %v1892_v37 = vmax.f32 %v3024_v38, 0.0  ;;  %v1893_v16 = vmax.f32 %v3026_v63, 0.0 }
 0x20f   :  { %v1894_v20 = vmax.f32 %v3028_v9, 0.0  ;;  %v1895_v34 = vmax.f32 %v3030_v14, 0.0  ;;  %v1896_v39 = vmax.f32 %v3032_v18, 0.0  ;;  %v1897_v57 = vmax.f32 %v3034_v23, 0.0 }
 0x210   :  { %v1898_v44 = vmax.f32 %v3036_v28, 0.0  ;;  %v1899_v49 = vmax.f32 %v3038_v29, 0.0  ;;  %v1900_v5 = vmax.f32 %v3040_v30, 0.0  ;;  %v1901_v12 = vmax.f32 %v3042_v31, 0.0 }
 0x211   :  { %v1902_v19 = vmax.f32 %v3044_v33, 0.0  ;;  %v1903_v58 = vmax.f32 %v3046_v35, 0.0  ;;  %v1904_v25 = vmax.f32 %v1868_v36, 0.0  ;;  %v1905_v40 = vmax.f32 %v1869_v41, 0.0 }
 0x212   :  { %v1906_v46 = vmax.f32 %v1870_v42, 0.0  ;;  %v1907_v54 = vmax.f32 %v3048_v43, 0.0  ;;  %v1908_v61 = vmax.f32 %v1872_v47, 0.0  ;;  %v1909_v21 = vmax.f32 %v1873_v48, 0.0 }
 0x213   :  { %v1910_v60 = vmax.f32 %v1874_v22, 0.0  ;;  %v1911_v6 = vmax.f32 %v1875_v24, 0.0  ;;  %v1912_v2 = vmax.f32 %v1876_v0, 0.0  ;;  %v1913_v15 = vmax.f32 %v1877_v11, 0.0 }
 0x214   :  { %v1914_v26 = vmax.f32 %v1878_v52, 0.0  ;;  %v1915_v3 = vmax.f32 %v3050_v50, 0.0  ;;  %v1916_v45 = vmax.f32 %v1880_v53, 0.0  ;;  %v1917_v51 = vmax.f32 %v1881_v56, 0.0 }
 0x215   :  { %v1918_v27 = vmax.f32 %v1882_v59, 0.0  ;;  %v2258_v32 = vpack.c.bf16 %v1886_v1, %v1885_v62  ;;  %v2259_v8 = vpack.c.bf16 %v1888_v7, %v1887_v4  ;;  %v2260_v38 = vpack.c.bf16 %v1890_v13, %v1889_v10 }
 0x216   :  { %v2261_v63 = vpack.c.bf16 %v1892_v37, %v1891_v55  ;;  %v2262_v9 = vpack.c.bf16 %v1894_v20, %v1893_v16  ;;  %v2263_v14 = vpack.c.bf16 %v1896_v39, %v1895_v34  ;;  %v2264_v18 = vpack.c.bf16 %v1898_v44, %v1897_v57 }
 0x217   :  { %v2265_v17 = vpack.c.bf16 %v1900_v5, %v1899_v49  ;;  %v2266_v23 = vpack.c.bf16 %v1902_v19, %v1901_v12  ;;  %v2267_v28 = vpack.c.bf16 %v1904_v25, %v1903_v58  ;;  %v2268_v29 = vpack.c.bf16 %v1906_v46, %v1905_v40  ;;  %2029 = vst [vmem:[#allocation7] sm:$0xff] %v2258_v32 }
 0x218   :  { %2030 = vst [vmem:[#allocation7 + $0x8] sm:$0xff] %v2259_v8  ;;  %2031 = vst [vmem:[#allocation7 + $0x10] sm:$0xff] %v2260_v38  ;;  %v2269_v30 = vpack.c.bf16 %v1908_v61, %v1907_v54  ;;  %v2270_v31 = vpack.c.bf16 %v1910_v60, %v1909_v21  ;;  %v2271_v33 = vpack.c.bf16 %v1912_v2, %v1911_v6 }
 0x219   :  { %v2272_v35 = vpack.c.bf16 %v1914_v26, %v1913_v15  ;;  %2032 = vst [vmem:[#allocation7 + $0x18] sm:$0xff] %v2261_v63  ;;  %2033 = vst [vmem:[#allocation7 + $0x20] sm:$0xff] %v2262_v9  ;;  %v2273_v36 = vpack.c.bf16 %v1916_v45, %v1915_v3  ;;  %v2274_v41 = vpack.c.bf16 %v1918_v27, %v1917_v51 }
 0x21a   :  { %2034 = vst [vmem:[#allocation7 + $0x28] sm:$0xff] %v2263_v14  ;;  %2035 = vst [vmem:[#allocation7 + $0x30] sm:$0xff] %v2264_v18 }
 0x21b   :  { %2036 = vst [vmem:[#allocation7 + $0x38] sm:$0xff] %v2265_v17  ;;  %2037 = vst [vmem:[#allocation7 + $0x40] sm:$0xff] %v2266_v23 }
 0x21c   :  { %2038 = vst [vmem:[#allocation7 + $0x48] sm:$0xff] %v2267_v28  ;;  %2039 = vst [vmem:[#allocation7 + $0x50] sm:$0xff] %v2268_v29 }
 0x21d   :  { %2040 = vst [vmem:[#allocation7 + $0x58] sm:$0xff] %v2269_v30  ;;  %2041 = vst [vmem:[#allocation7 + $0x60] sm:$0xff] %v2270_v31 }
 0x21e   :  { %2042 = vst [vmem:[#allocation7 + $0x68] sm:$0xff] %v2271_v33  ;;  %2043 = vst [vmem:[#allocation7 + $0x70] sm:$0xff] %v2272_v35 }
 0x21f   :  { %2044 = vst [vmem:[#allocation7 + $0x78] sm:$0xff] %v2273_v36  ;;  %2045 = vst [vmem:[#allocation7 + $0x80] sm:$0xff] %v2274_v41 }
 0x220   :  { %2710 = shalt.err (!%p2707_p6)
}
 0x221   :  { %s2711_s22 = scalar_lea.hbm %s3092_s4, 2304 }
 0x222   :  { %p2712_p7 = scmp.ne.s32.totalorder %s3092_s4, %s2711_s22  ;;  %p2715_p8 = scmp.lt.u32.totalorder %s2711_s22, %s3092_s4 }
 0x224   :  { %p2717_p9 = pnand %p2715_p8, %p2712_p7 }
 0x226   :  { %2720 = shalt.err (!%p2717_p9)
}
 0x227   :  { %2058 = dma.vmem_to_hbm [thread:$0]  %s2053_s18, 2304, %s3092_s4, [#allocation4], %s2731_s0, %s2731_s0, %s2732_s13  }
 0x228   :  { %2725 = dma.done.wait [#allocation4], 2304  }
 0x229   :  { %2726 = vsyncadd [#allocation4], 4294964992 }
 0x22a   :  { %2062 = vsyncpa [#allocation3], 1 }
 0x22b   :  { %2063 = vsyncpa [#allocation6], 1 }
 0x22c   :  { %2064 = vsyncpa [#allocation4], 1 }

</bundles_post_ra>
